<compile_context>
chip_gen: v6e
topology: v6e:2x2x1
jax: 0.10.0
libtpu: 0.0.40
codegen_flags: <defaults>
</compile_context>

<pallas_src>
import functools

import jax
import jax.numpy as jnp
from jax.experimental import pallas as pl
from jax.experimental.pallas import tpu as pltpu


def actor_mlp_kernel(x_ref, w1_ref, b1_ref, w2_ref, b2_ref, w3_ref, b3_ref, o_ref):
    """One batch tile through the full 3-layer MLP (no HBM round trips)."""
    x = x_ref[...]

    # Layer 1: Linear + ReLU (f32 operands, f32 accumulate).
    h1 = jnp.dot(x, w1_ref[...], preferred_element_type=jnp.float32) + b1_ref[...]
    h1 = jnp.maximum(h1, 0.0)

    # Layer 2: Linear + ReLU.
    h2 = jnp.dot(h1, w2_ref[...], preferred_element_type=jnp.float32) + b2_ref[...]
    h2 = jnp.maximum(h2, 0.0)

    # Layer 3: mean_actions head (no activation).
    out = jnp.dot(h2, w3_ref[...], preferred_element_type=jnp.float32) + b3_ref[...]
    o_ref[...] = out.astype(o_ref.dtype)


def _round_up(x, m):
    return ((x + m - 1) // m) * m


def _choose_batch_tile(B, tile_b):
    """Static batch-tile selection (shapes are static under jit)."""
    b8 = _round_up(B, 8)              # f32 sublane minimum
    tile = min(tile_b, b8)            # small-batch clamp: never compute > round_up(B, 8) rows
    # Keep >= 2 batch tiles when the batch allows it so v7x's two TensorCores
    # both get work under dimension_semantics=("parallel",).  Harmless on
    # single-TC chips (v5e/v6e): one extra ~0.35 us grid step.
    if b8 >= 16 and pl.cdiv(b8, tile) < 2:
        tile = _round_up(pl.cdiv(b8, 2), 8)
    return tile


@functools.partial(jax.jit, static_argnames=("tile_b",))
def actor_forward(state, params, *, tile_b=1024):
    """Fused ActorNN forward. state: [B, input_dims] f32 -> [B, action_dims] f32."""
    w1, b1, w2, b2, w3, b3 = params
    B, in_dims = state.shape
    action_dims = w3.shape[1]

    tile = _choose_batch_tile(B, tile_b)
    grid = (pl.cdiv(B, tile),)        # partial last block handled by Pallas; no jnp.pad copy

    # Weights/biases: constant index_map -> DMA'd once, VMEM-resident across the grid.
    resident = lambda a: pl.BlockSpec(a.shape, lambda i: (0, 0))

    return pl.pallas_call(
        actor_mlp_kernel,
        out_shape=jax.ShapeDtypeStruct((B, action_dims), jnp.float32),
        grid=grid,
        in_specs=[
            pl.BlockSpec((tile, in_dims), lambda i: (i, 0)),   # streaming state tile
            resident(w1), resident(b1),
            resident(w2), resident(b2),
            resident(w3), resident(b3),
        ],
        out_specs=pl.BlockSpec((tile, action_dims), lambda i: (i, 0)),
        compiler_params=pltpu.CompilerParams(
            dimension_semantics=("parallel",),
        ),
    )(state, w1, b1, w2, b2, w3, b3)


def init_actor_params(key, input_dims, fc1_dims, fc2_dims, action_dims):
    """PyTorch nn.Linear default init (U[-1/sqrt(fan_in), +1/sqrt(fan_in)]).
    Weights stored as [in, out] (transpose of nn.Linear's [out, in]); biases [1, out]."""
    ks = jax.random.split(key, 6)

    def linear(kw, kb, fan_in, fan_out):
        bound = 1.0 / jnp.sqrt(fan_in)
        w = jax.random.uniform(kw, (fan_in, fan_out), jnp.float32, -bound, bound)
        b = jax.random.uniform(kb, (1, fan_out), jnp.float32, -bound, bound)
        return w, b

    w1, b1 = linear(ks[0], ks[1], input_dims, fc1_dims)
    w2, b2 = linear(ks[2], ks[3], fc1_dims, fc2_dims)
    w3, b3 = linear(ks[4], ks[5], fc2_dims, action_dims)
    return (w1, b1, w2, b2, w3, b3)


@jax.jit
def actor_reference(state, params):
    """Pure-JAX reference (same f32 storage, default MXU precision)."""
    w1, b1, w2, b2, w3, b3 = params
    h1 = jnp.maximum(jnp.dot(state, w1) + b1, 0.0)
    h2 = jnp.maximum(jnp.dot(h1, w2) + b2, 0.0)
    return jnp.dot(h2, w3) + b3


if __name__ == "__main__":
    input_dims = 32
    fc1_dims = 64
    fc2_dims = 64
    action_dims = 8

    key = jax.random.PRNGKey(0)
    k_state, k_params, k_big = jax.random.split(key, 3)
    params = init_actor_params(k_params, input_dims, fc1_dims, fc2_dims, action_dims)

    # Small inference-style batch: exercises the clamped 8-row tile + partial block.
    state = jax.random.normal(k_state, (4, input_dims), jnp.float32)
    mean_actions = jax.block_until_ready(actor_forward(state, params))
    assert mean_actions.shape == (4, action_dims)
    # Tolerance covers default-precision (bf16-pass) MXU rounding differences.
    assert jnp.allclose(mean_actions, actor_reference(state, params), atol=2e-2, rtol=2e-2)

    # Larger, non-tile-divisible batch: exercises the multi-tile grid (>=2 tiles
    # for v7x's two TensorCores) and the partial last block with no jnp.pad.
    big_state = jax.random.normal(k_big, (1000, input_dims), jnp.float32)
    big_out = jax.block_until_ready(actor_forward(big_state, params))
    assert big_out.shape == (1000, action_dims)
    assert jnp.allclose(big_out, actor_reference(big_state, params), atol=2e-2, rtol=2e-2)

    # TODO(synk): Adam optimizer / training step of ActorNN is out of scope for
    # the forward-pass kernel.

    print("KERNEL_OK")
</pallas_src>

<mosaic_0001>
module attributes {stable_mosaic.version = 11 : i64} {
  func.func @actor_mlp_kernel(%arg0: i32, %arg1: memref<8x32xf32, #tpu.memory_space<vmem>>, %arg2: memref<32x64xf32, #tpu.memory_space<vmem>>, %arg3: memref<1x64xf32, #tpu.memory_space<vmem>>, %arg4: memref<64x64xf32, #tpu.memory_space<vmem>>, %arg5: memref<1x64xf32, #tpu.memory_space<vmem>>, %arg6: memref<64x8xf32, #tpu.memory_space<vmem>>, %arg7: memref<1x8xf32, #tpu.memory_space<vmem>>, %arg8: memref<8x8xf32, #tpu.memory_space<vmem>>) attributes {dimension_semantics = [#tpu.dimension_semantics<parallel>], iteration_bounds = array<i64: 1>, scalar_prefetch = 0 : i64, scratch_operands = 0 : i64, tpu.core_type = #tpu.core_type<tc>, window_params = [{transform_indices = @transform_0, window_bounds = array<i64: 8, 32>}, {pipeline_mode = #tpu.pipeline_mode<synchronous>, transform_indices = @transform_1, window_bounds = array<i64: 32, 64>}, {pipeline_mode = #tpu.pipeline_mode<synchronous>, transform_indices = @transform_2, window_bounds = array<i64: 1, 64>}, {pipeline_mode = #tpu.pipeline_mode<synchronous>, transform_indices = @transform_3, window_bounds = array<i64: 64, 64>}, {pipeline_mode = #tpu.pipeline_mode<synchronous>, transform_indices = @transform_4, window_bounds = array<i64: 1, 64>}, {pipeline_mode = #tpu.pipeline_mode<synchronous>, transform_indices = @transform_5, window_bounds = array<i64: 64, 8>}, {pipeline_mode = #tpu.pipeline_mode<synchronous>, transform_indices = @transform_6, window_bounds = array<i64: 1, 8>}, {transform_indices = @transform_7, window_bounds = array<i64: 8, 8>}]} {
    %c0 = arith.constant 0 : index
    %c0_0 = arith.constant 0 : index
    %0 = vector.load %arg1[%c0, %c0_0] : memref<8x32xf32, #tpu.memory_space<vmem>>, vector<8x32xf32>
    %c0_1 = arith.constant 0 : index
    %c0_2 = arith.constant 0 : index
    %1 = vector.load %arg2[%c0_1, %c0_2] : memref<32x64xf32, #tpu.memory_space<vmem>>, vector<32x64xf32>
    %cst = arith.constant dense<0.000000e+00> : vector<8x64xf32>
    %2 = tpu.matmul %0, %1, %cst {dimension_numbers = #tpu.dot_dimension_numbers<[1], [0], [0], [1], [0, 0, 1, 1], [], []>} : vector<8x32xf32>, vector<32x64xf32>, vector<8x64xf32> -> vector<8x64xf32>
    %c0_3 = arith.constant 0 : index
    %c0_4 = arith.constant 0 : index
    %3 = vector.load %arg3[%c0_3, %c0_4] : memref<1x64xf32, #tpu.memory_space<vmem>>, vector<1x64xf32>
    %4 = vector.broadcast %3 : vector<1x64xf32> to vector<8x64xf32>
    %5 = arith.addf %2, %4 : vector<8x64xf32>
    %cst_5 = arith.constant 0.000000e+00 : f32
    %6 = vector.broadcast %cst_5 : f32 to vector<8x64xf32>
    %7 = arith.maximumf %5, %6 : vector<8x64xf32>
    %c0_6 = arith.constant 0 : index
    %c0_7 = arith.constant 0 : index
    %8 = vector.load %arg4[%c0_6, %c0_7] : memref<64x64xf32, #tpu.memory_space<vmem>>, vector<64x64xf32>
    %cst_8 = arith.constant dense<0.000000e+00> : vector<8x64xf32>
    %9 = tpu.matmul %7, %8, %cst_8 {dimension_numbers = #tpu.dot_dimension_numbers<[1], [0], [0], [1], [0, 0, 1, 1], [], []>} : vector<8x64xf32>, vector<64x64xf32>, vector<8x64xf32> -> vector<8x64xf32>
    %c0_9 = arith.constant 0 : index
    %c0_10 = arith.constant 0 : index
    %10 = vector.load %arg5[%c0_9, %c0_10] : memref<1x64xf32, #tpu.memory_space<vmem>>, vector<1x64xf32>
    %11 = vector.broadcast %10 : vector<1x64xf32> to vector<8x64xf32>
    %12 = arith.addf %9, %11 : vector<8x64xf32>
    %cst_11 = arith.constant 0.000000e+00 : f32
    %13 = vector.broadcast %cst_11 : f32 to vector<8x64xf32>
    %14 = arith.maximumf %12, %13 : vector<8x64xf32>
    %c0_12 = arith.constant 0 : index
    %c0_13 = arith.constant 0 : index
    %15 = vector.load %arg6[%c0_12, %c0_13] : memref<64x8xf32, #tpu.memory_space<vmem>>, vector<64x8xf32>
    %cst_14 = arith.constant dense<0.000000e+00> : vector<8x8xf32>
    %16 = tpu.matmul %14, %15, %cst_14 {dimension_numbers = #tpu.dot_dimension_numbers<[1], [0], [0], [1], [0, 0, 1, 1], [], []>} : vector<8x64xf32>, vector<64x8xf32>, vector<8x8xf32> -> vector<8x8xf32>
    %c0_15 = arith.constant 0 : index
    %c0_16 = arith.constant 0 : index
    %17 = vector.load %arg7[%c0_15, %c0_16] : memref<1x8xf32, #tpu.memory_space<vmem>>, vector<1x8xf32>
    %18 = vector.broadcast %17 : vector<1x8xf32> to vector<8x8xf32>
    %19 = arith.addf %16, %18 : vector<8x8xf32>
    %c0_17 = arith.constant 0 : index
    %c0_18 = arith.constant 0 : index
    %20 = vector.load %arg8[%c0_17, %c0_18] : memref<8x8xf32, #tpu.memory_space<vmem>>, vector<8x8xf32>
    tpu.vector_store %arg8[%c0_17, %c0_18], %19 {strides = array<i32>} : memref<8x8xf32, #tpu.memory_space<vmem>>, vector<8x8xf32>,
    return
  }
  func.func @transform_0(%arg0: i32) -> (i32, i32) {
    %c0_i32 = arith.constant 0 : i32
    %c0_i32_0 = arith.constant 0 : i32
    return %arg0, %c0_i32 : i32, i32
  }
  func.func @transform_1(%arg0: i32) -> (i32, i32) {
    %c0_i32 = arith.constant 0 : i32
    %c0_i32_0 = arith.constant 0 : i32
    %c0_i32_1 = arith.constant 0 : i32
    return %c0_i32, %c0_i32_0 : i32, i32
  }
  func.func @transform_2(%arg0: i32) -> (i32, i32) {
    %c0_i32 = arith.constant 0 : i32
    %c0_i32_0 = arith.constant 0 : i32
    %c0_i32_1 = arith.constant 0 : i32
    return %c0_i32, %c0_i32_0 : i32, i32
  }
  func.func @transform_3(%arg0: i32) -> (i32, i32) {
    %c0_i32 = arith.constant 0 : i32
    %c0_i32_0 = arith.constant 0 : i32
    %c0_i32_1 = arith.constant 0 : i32
    return %c0_i32, %c0_i32_0 : i32, i32
  }
  func.func @transform_4(%arg0: i32) -> (i32, i32) {
    %c0_i32 = arith.constant 0 : i32
    %c0_i32_0 = arith.constant 0 : i32
    %c0_i32_1 = arith.constant 0 : i32
    return %c0_i32, %c0_i32_0 : i32, i32
  }
  func.func @transform_5(%arg0: i32) -> (i32, i32) {
    %c0_i32 = arith.constant 0 : i32
    %c0_i32_0 = arith.constant 0 : i32
    %c0_i32_1 = arith.constant 0 : i32
    return %c0_i32, %c0_i32_0 : i32, i32
  }
  func.func @transform_6(%arg0: i32) -> (i32, i32) {
    %c0_i32 = arith.constant 0 : i32
    %c0_i32_0 = arith.constant 0 : i32
    %c0_i32_1 = arith.constant 0 : i32
    return %c0_i32, %c0_i32_0 : i32, i32
  }
  func.func @transform_7(%arg0: i32) -> (i32, i32) {
    %c0_i32 = arith.constant 0 : i32
    %c0_i32_0 = arith.constant 0 : i32
    return %arg0, %c0_i32 : i32, i32
  }
}

</mosaic_0001>

<bundles_post_ra>
// kernel: actor_forward.1
= control target key start
LH: loop header
LB: loop body
LE: loop exit
PB: predicated region body
PF: predicated region fallthrough
CT: control target
= control target key end

     0   :  { %12 = vsyncpa [#allocation3], 0  ;;  %s597_s0 = inlined_call_operand.vmem [shape: f32[4,32], index: 0, kind: input, shape index: {}]   ;;  %s598_s1 = inlined_call_operand.hbm [shape: f32[32,64], index: 1, kind: input, shape index: {}]   ;;  %s599_s2 = inlined_call_operand.vmem [shape: f32[1,64], index: 2, kind: input, shape index: {}]   ;;  %s600_s3 = inlined_call_operand.vmem [shape: f32[64,64], index: 3, kind: input, shape index: {}]   ;;  %s601_s4 = inlined_call_operand.vmem [shape: f32[1,64], index: 4, kind: input, shape index: {}]   ;;  %s602_s5 = inlined_call_operand.vmem [shape: f32[64,8], index: 5, kind: input, shape index: {}]   ;;  %s603_s6 = inlined_call_operand.vmem [shape: f32[1,8], index: 6, kind: input, shape index: {}]   ;;  %s604_s7 = inlined_call_operand.hbm [shape: f32[4,8], index: 7, kind: output, shape index: {}]  }
   0x1   :  { %13 = vsyncpa [#allocation4], 0  ;;  %s455_s24 = smov [#allocation2]  }
   0x2   :  { %s21_s25 = sshll.u32 %s455_s24, 4  ;;  %s22_s25 = int_to_ptr.vmem [resolvable:$true] %s21_s25 }
   0x3   :  { %s419_s26 = scalar_lea.vmem %s22_s25, 512  ;;  %p424_p1 = scmp.lt.s32.totalorder %s22_s25, %s22_s25 }
   0x4   :  { %p420_p0 = scmp.ne.s32.totalorder %s22_s25, %s419_s26  ;;  %p425_p2 = scmp.lt.s32.totalorder %s419_s26, %s419_s26 }
   0x6   :  { %p426_p3 = por %p425_p2, %p424_p1 }
   0x8   :  { %p427_p4 = pnand %p426_p3, %p420_p0 }
   0xa   :  { %430 = shalt.err (!%p427_p4)
}
   0xb   :  { %s456_s27 = smov 128   ;;  %s457_s28 = smov 8  }
   0xc   :  { %27 = dma.hbm_to_vmem [thread:$0]  %s598_s1, 512, %s22_s25, [#allocation3], %s456_s27, %s456_s27, %s457_s28  }
   0xd   :  { %451 = dma.done.wait [#allocation3], 512  }
   0xe   :  { %452 = vsyncadd [#allocation3], 4294966784  ;;  %v458_v0 = vmov 0.0   ;;  %vm459_vm0 = vmmov 0   ;;  %v45_v1 = vld [vmem:[#allocation2 + $0x18] sm:$0xff]  ;;  %v44_v2 = vld [vmem:[#allocation2 + $0x10] sm:$0xff] }
   0xf   :  { %354 = vmatprep.subr.mxu0 %v458_v0  ;;  %362 = vmatprep.mubr.msk.f32.mxu0 %vm459_vm0, %v458_v0  ;;  %v135_v3 = vld [vmem:[%s600_s3 + $0x38] sm:$0xff]  ;;  %v43_v4 = vld [vmem:[#allocation2 + $0x8] sm:$0xff]  ;;  %v134_v5 = vld [vmem:[%s600_s3 + $0x30] sm:$0xff]  ;;  %vm53_vm1 = vcmask 261120   ;;  %vm143_vm2 = vcmask 523264   ;;  %vm306_vm3 = vcmask 64512  }
  0x10   :  { %365 = vmatprep.subr.mxu1 %v458_v0  ;;  %381 = vmatprep.mubr.msk.f32.mxu1 %vm459_vm0, %v458_v0  ;;  %v133_v6 = vld [vmem:[%s600_s3 + $0x28] sm:$0xff]  ;;  %v42_v7 = vld [vmem:[#allocation2] sm:$0xff]  ;;  %v131_v10 = vld [vmem:[%s600_s3 + $0x18] sm:$0xff] }
  0x11   :  { %355 = vmatpush3.msra.mxu0 %v45_v1  ;;  %366 = vmatpush3.msra.mxu1 %v135_v3  ;;  %v41_v8 = vld [vmem:[%s597_s0] sm:$0xff]  ;;  %v130_v11 = vld [vmem:[%s600_s3 + $0x10] sm:$0xff]  ;;  %v129_v12 = vld [vmem:[%s600_s3 + $0x8] sm:$0xff] }
  0x12   :  { %356 = vmatprep.subr.mxu0 %v458_v0  ;;  %367 = vmatprep.subr.mxu1 %v458_v0  ;;  %v132_v9 = vld [vmem:[%s600_s3 + $0x20] sm:$0xff]  ;;  %v225_v14 = vld [vmem:[%s602_s5 + $0x38] sm:$0xff]  ;;  %v224_v15 = vld [vmem:[%s602_s5 + $0x30] sm:$0xff] }
  0x13   :  { %357 = vmatpush3.msra.mxu0 %v44_v2  ;;  %368 = vmatpush3.msra.mxu1 %v134_v5  ;;  %v128_v13 = vld [vmem:[%s600_s3] sm:$0xff]  ;;  %v223_v16 = vld [vmem:[%s602_s5 + $0x28] sm:$0xff]  ;;  %v221_v18 = vld [vmem:[%s602_s5 + $0x18] sm:$0xff] }
  0x14   :  { %358 = vmatprep.subr.mxu0 %v458_v0  ;;  %369 = vmatprep.subr.mxu1 %v458_v0  ;;  %v222_v17 = vld [vmem:[%s602_s5 + $0x20] sm:$0xff]  ;;  %v220_v24 = vld [vmem:[%s602_s5 + $0x10] sm:$0xff]  ;;  %v219_v25 = vld [vmem:[%s602_s5 + $0x8] sm:$0xff] }
  0x15   :  { %359 = vmatpush3.msra.mxu0 %v43_v4  ;;  %370 = vmatpush3.msra.mxu1 %v133_v6  ;;  %v325_v19 = vld [vmem:[%s599_s2] ss:$0 sm:$0xff] }
  0x16   :  { %360 = vmatprep.subr.mxu0 %v458_v0  ;;  %371 = vmatprep.subr.mxu1 %v458_v0  ;;  %v218_v26 = vld [vmem:[%s602_s5] sm:$0xff] }
  0x17   :  { %361 = vmatpush3.msra.mxu0 %v42_v7  ;;  %372 = vmatpush3.msra.mxu1 %v132_v9  ;;  %v327_v27 = vld [vmem:[%s601_s4] ss:$0 sm:$0xff] }
  0x18   :  { %363 = vmatmul.mubr.msk.f32.vlgmr.msra.gmra.mxu0 %vm53_vm1, %v41_v8  ;;  %373 = vmatprep.subr.mxu1 %v458_v0  ;;  %v329_v32 = vld [vmem:[%s603_s6] ss:$0 sm:$0xff] }
  0x19   :  { %384 = vmatprep.subr.mxu0 %v458_v0  ;;  %374 = vmatpush3.msra.mxu1 %v131_v10 }
  0x1a   :  { %400 = vmatprep.mubr.msk.f32.mxu0 %vm459_vm0, %v458_v0  ;;  %375 = vmatprep.subr.mxu1 %v458_v0 }
  0x1b   :  { %376 = vmatpush3.msra.mxu1 %v130_v11  ;;  %385 = vmatpush3.msra.mxu0 %v225_v14 }
  0x1c   :  { %377 = vmatprep.subr.mxu1 %v458_v0  ;;  %386 = vmatprep.subr.mxu0 %v458_v0 }
  0x1d   :  { %378 = vmatpush3.msra.mxu1 %v129_v12  ;;  %387 = vmatpush3.msra.mxu0 %v224_v15 }
  0x1e   :  { %379 = vmatprep.subr.mxu1 %v458_v0  ;;  %388 = vmatprep.subr.mxu0 %v458_v0 }
  0x1f   :  { %380 = vmatpush3.msra.mxu1 %v128_v13  ;;  %389 = vmatpush3.msra.mxu0 %v223_v16 }
  0x20   :  { %390 = vmatprep.subr.mxu0 %v458_v0 }
  0x21   :  { %391 = vmatpush3.msra.mxu0 %v222_v17 }
  0x22   :  { %392 = vmatprep.subr.mxu0 %v458_v0 }
  0x23   :  { %393 = vmatpush3.msra.mxu0 %v221_v18 }
  0x24   :  { %394 = vmatprep.subr.mxu0 %v458_v0 }
  0x25   :  { %395 = vmatpush3.msra.mxu0 %v220_v24 }
  0x26   :  { %396 = vmatprep.subr.mxu0 %v458_v0 }
  0x27   :  { %397 = vmatpush3.msra.mxu0 %v219_v25 }
  0x28   :  { %398 = vmatprep.subr.mxu0 %v458_v0 }
  0x29   :  { %399 = vmatpush3.msra.mxu0 %v218_v26 }
  0xd8   :  { %v123_v20 = vpop.f32.mrf.mxu0 }
  0xd9   :  { %v124_v21 = vadd.f32 %v325_v19, %v123_v20 }
  0xda   :  { %v364_v22 = vpop.f32.mrf.mxu0 }
  0xdb   :  { %v127_v23 = vmax.f32 %v124_v21, 0.0 }
  0xdd   :  { %382 = vmatmul.mubr.msk.f32.vlgmr.msra.gmra.mxu1 %vm143_vm2, %v127_v23 }
 0x19d   :  { %v213_v28 = vpop.f32.mrf.mxu1 }
 0x19e   :  { %v214_v29 = vadd.f32 %v327_v27, %v213_v28 }
 0x19f   :  { %v383_v30 = vpop.f32.mrf.mxu1 }
 0x1a0   :  { %v217_v31 = vmax.f32 %v214_v29, 0.0 }
 0x1a2   :  { %401 = vmatmul.mubr.msk.f32.vlgmr.msra.gmra.mxu0 %vm143_vm2, %v217_v31 }
 0x262   :  { %v302_v33 = vpop.f32.mrf.mxu0 }
 0x263   :  { %v303_v34 = vadd.f32 %v329_v32, %v302_v33 }
 0x264   :  { %v402_v35 = vpop.f32.mrf.mxu0 }
 0x265   :  { %307 = vst.msk [vmem:[#allocation5] sm:$0xff] %vm306_vm3, %v303_v34 }
 0x266   :  { %312 = vsyncadd [#allocation4], 64  ;;  %s460_s5 = smov [#allocation5]  }
 0x267   :  { %s313_s19 = sshll.u32 %s460_s5, 4  ;;  %s314_s19 = int_to_ptr.vmem [resolvable:$true] %s313_s19 }
 0x268   :  { %s431_s4 = scalar_lea.vmem %s314_s19, 64  ;;  %s435_s20 = scalar_lea.vmem %s314_s19, 128 }
 0x269   :  { %p432_p5 = scmp.ne.s32.totalorder %s314_s19, %s431_s4  ;;  %p436_p6 = scmp.lt.s32.totalorder %s314_s19, %s314_s19 }
 0x26a   :  { %p437_p7 = scmp.lt.s32.totalorder %s435_s20, %s431_s4 }
 0x26c   :  { %p438_p8 = por %p437_p7, %p436_p6 }
 0x26e   :  { %p439_p9 = pnand %p438_p8, %p432_p5 }
 0x270   :  { %442 = shalt.err (!%p439_p9)
}
 0x271   :  { %s461_s21 = smov 64   ;;  %s462_s22 = smov 4  }
 0x272   :  { %319 = dma.vmem_to_hbm [thread:$0]  %s314_s19, 64, %s604_s7, [#allocation4], %s461_s21, %s461_s21, %s462_s22  }
 0x273   :  { %453 = dma.done.wait [#allocation4], 128  }
 0x274   :  { %454 = vsyncadd [#allocation4], 4294967168 }
 0x275   :  { %323 = vsyncpa [#allocation3], 1 }
 0x276   :  { %324 = vsyncpa [#allocation4], 1 }

</bundles_post_ra>
